<compile_context>
chip_gen: v7x
topology: tpu7x:2x2x1
jax: 0.10.0
libtpu: 0.0.40
codegen_flags: <defaults>
</compile_context>

<pallas_src>
import functools

import jax
import jax.numpy as jnp
from jax.experimental import pallas as pl
from jax.experimental.pallas import tpu as pltpu


def _ffn_kernel(x_ref, w1_ref, b1_ref, w2_ref, b2_ref, o_ref):
    # x_ref: (tm, d_model) bf16, w1: (d_model, d_ff) bf16, b1: (1, d_ff) f32
    # w2: (d_ff, d_model) bf16, b2: (1, d_model) f32, o_ref: (tm, d_model) out dtype
    x = x_ref[...]
    h = jnp.dot(x, w1_ref[...], preferred_element_type=jnp.float32)
    h = jnp.maximum(h + b1_ref[...], 0.0)          # bias + ReLU in f32
    # Dropout(p) in eval mode == identity.
    h = h.astype(w2_ref.dtype)                     # bf16 feed for the second MXU pass
    y = jnp.dot(h, w2_ref[...], preferred_element_type=jnp.float32) + b2_ref[...]
    o_ref[...] = y.astype(o_ref.dtype)


def _round_up(v, m):
    return (v + m - 1) // m * m


@functools.partial(jax.jit, static_argnames=("tm", "compute_dtype"))
def positionwise_ffn(x, w1, b1, w2, b2, *, tm=256, compute_dtype=jnp.bfloat16):
    """x: (batch, seq, d_model) -> (batch, seq, d_model)."""
    batch, seq, d_model = x.shape
    d_ff = w1.shape[1]
    rows = batch * seq

    # Effective row tile: large (256) for MXU utilization, shrunk for tiny inputs;
    # always a multiple of 8 (sublane).  Pad rows so the grid divides evenly.
    tm_eff = min(tm, _round_up(rows, 8))
    rows_padded = _round_up(rows, tm_eff)
    grid = (rows_padded // tm_eff,)

    x2 = x.reshape(rows, d_model).astype(compute_dtype)
    if rows_padded != rows:
        x2 = jnp.pad(x2, ((0, rows_padded - rows), (0, 0)))
    w1c = w1.astype(compute_dtype)
    w2c = w2.astype(compute_dtype)
    b1_2 = b1.reshape(1, d_ff).astype(jnp.float32)
    b2_2 = b2.reshape(1, d_model).astype(jnp.float32)

    # --- VMEM budget (double-buffered inputs/outputs + f32 intermediate) ---
    cb = jnp.dtype(compute_dtype).itemsize
    ob = jnp.dtype(x.dtype).itemsize
    vmem_needed = (
        2 * tm_eff * d_model * cb          # x tile (double-buffered)
        + 2 * tm_eff * d_model * ob        # out tile
        + 2 * d_model * d_ff * cb          # W1 (resident, 2 buffers)
        + 2 * d_ff * d_model * cb          # W2
        + 2 * 8 * d_ff * 4                 # b1 (padded to 8 sublanes)
        + 2 * 8 * d_model * 4              # b2
        + tm_eff * d_ff * 4                # h intermediate (f32)
    )
    vmem_limit = min(128 << 20, max(32 << 20, int(vmem_needed * 1.5)))

    cost = pl.CostEstimate(
        flops=4 * rows_padded * d_model * d_ff,   # two matmuls, 2*M*K*N each
        transcendentals=0,
        bytes_accessed=(
            rows_padded * d_model * cb
            + d_model * d_ff * cb + d_ff * d_model * cb
            + d_ff * 4 + d_model * 4
            + rows_padded * d_model * ob
        ),
    )

    out2 = pl.pallas_call(
        _ffn_kernel,
        out_shape=jax.ShapeDtypeStruct((rows_padded, d_model), x.dtype),
        grid_spec=pltpu.PrefetchScalarGridSpec(
            num_scalar_prefetch=0,
            grid=grid,
            in_specs=[
                pl.BlockSpec((tm_eff, d_model), lambda i: (i, 0)),   # x tile
                pl.BlockSpec((d_model, d_ff), lambda i: (0, 0)),     # W1 (resident)
                pl.BlockSpec((1, d_ff), lambda i: (0, 0)),           # b1
                pl.BlockSpec((d_ff, d_model), lambda i: (0, 0)),     # W2 (resident)
                pl.BlockSpec((1, d_model), lambda i: (0, 0)),        # b2
            ],
            out_specs=pl.BlockSpec((tm_eff, d_model), lambda i: (i, 0)),
        ),
        compiler_params=pltpu.CompilerParams(
            dimension_semantics=("parallel",),
            vmem_limit_bytes=vmem_limit,
        ),
        cost_estimate=cost,
    )(x2, w1c, b1_2, w2c, b2_2)

    return out2[:rows].reshape(batch, seq, d_model)


def _init_linear(key, fan_in, fan_out, dtype=jnp.float32):
    # Deterministic PyTorch-style uniform(-1/sqrt(fan_in), 1/sqrt(fan_in)).
    kw, kb = jax.random.split(key)
    bound = 1.0 / jnp.sqrt(fan_in)
    w = jax.random.uniform(kw, (fan_in, fan_out), dtype, -bound, bound)
    b = jax.random.uniform(kb, (fan_out,), dtype, -bound, bound)
    return w, b


if __name__ == "__main__":
    d_model = 128
    d_ff = 256
    batch, seq = 2, 8

    key = jax.random.PRNGKey(0)
    kx, k1, k2 = jax.random.split(key, 3)

    x = jax.random.normal(kx, (batch, seq, d_model), jnp.float32)
    w1, b1 = _init_linear(k1, d_model, d_ff)   # Linear(d_model -> d_ff)
    w2, b2 = _init_linear(k2, d_ff, d_model)   # Linear(d_ff -> d_model)

    out = positionwise_ffn(x, w1, b1, w2, b2, tm=256)
    out = jax.block_until_ready(out)
    assert out.shape == (batch, seq, d_model)

    # Reference with the same bf16 compute / f32 accumulate path (tight tolerance).
    xb = x.astype(jnp.bfloat16)
    w1b = w1.astype(jnp.bfloat16)
    w2b = w2.astype(jnp.bfloat16)
    h_ref = jnp.maximum(
        jnp.dot(xb, w1b, preferred_element_type=jnp.float32) + b1, 0.0)
    ref_bf16 = jnp.dot(h_ref.astype(jnp.bfloat16), w2b,
                       preferred_element_type=jnp.float32) + b2
    assert jnp.allclose(out, ref_bf16, atol=1e-4, rtol=1e-4)

    # Pure f32 reference (loose tolerance for bf16 operand quantization).
    ref_f32 = jnp.maximum(x @ w1 + b1, 0.0) @ w2 + b2
    assert jnp.allclose(out, ref_f32, atol=5e-2, rtol=5e-2)

    print("KERNEL_OK")
</pallas_src>

<mosaic_0001>
module attributes {stable_mosaic.version = 11 : i64} {
  func.func @_ffn_kernel(%arg0: i32, %arg1: memref<16x128xbf16, #tpu.memory_space<vmem>>, %arg2: memref<128x256xbf16, #tpu.memory_space<vmem>>, %arg3: memref<1x256xf32, #tpu.memory_space<vmem>>, %arg4: memref<256x128xbf16, #tpu.memory_space<vmem>>, %arg5: memref<1x128xf32, #tpu.memory_space<vmem>>, %arg6: memref<16x128xf32, #tpu.memory_space<vmem>>) attributes {dimension_semantics = [#tpu.dimension_semantics<parallel>], iteration_bounds = array<i64: 1>, scalar_prefetch = 0 : i64, scratch_operands = 0 : i64, tpu.core_type = #tpu.core_type<tc>, window_params = [{transform_indices = @transform_0, window_bounds = array<i64: 16, 128>}, {pipeline_mode = #tpu.pipeline_mode<synchronous>, transform_indices = @transform_1, window_bounds = array<i64: 128, 256>}, {pipeline_mode = #tpu.pipeline_mode<synchronous>, transform_indices = @transform_2, window_bounds = array<i64: 1, 256>}, {pipeline_mode = #tpu.pipeline_mode<synchronous>, transform_indices = @transform_3, window_bounds = array<i64: 256, 128>}, {pipeline_mode = #tpu.pipeline_mode<synchronous>, transform_indices = @transform_4, window_bounds = array<i64: 1, 128>}, {transform_indices = @transform_5, window_bounds = array<i64: 16, 128>}]} {
    %c0 = arith.constant 0 : index
    %c0_0 = arith.constant 0 : index
    %0 = vector.load %arg1[%c0, %c0_0] : memref<16x128xbf16, #tpu.memory_space<vmem>>, vector<16x128xbf16>
    %c0_1 = arith.constant 0 : index
    %c0_2 = arith.constant 0 : index
    %1 = vector.load %arg2[%c0_1, %c0_2] : memref<128x256xbf16, #tpu.memory_space<vmem>>, vector<128x256xbf16>
    %cst = arith.constant dense<0.000000e+00> : vector<16x256xf32>
    %2 = tpu.matmul %0, %1, %cst {dimension_numbers = #tpu.dot_dimension_numbers<[1], [0], [0], [1], [0, 0, 1, 1], [], []>} : vector<16x128xbf16>, vector<128x256xbf16>, vector<16x256xf32> -> vector<16x256xf32>
    %c0_3 = arith.constant 0 : index
    %c0_4 = arith.constant 0 : index
    %3 = vector.load %arg3[%c0_3, %c0_4] : memref<1x256xf32, #tpu.memory_space<vmem>>, vector<1x256xf32>
    %4 = vector.broadcast %3 : vector<1x256xf32> to vector<16x256xf32>
    %5 = arith.addf %2, %4 : vector<16x256xf32>
    %cst_5 = arith.constant 0.000000e+00 : f32
    %6 = vector.broadcast %cst_5 : f32 to vector<16x256xf32>
    %7 = arith.maximumf %5, %6 : vector<16x256xf32>
    %8 = arith.truncf %7 : vector<16x256xf32> to vector<16x256xbf16>
    %c0_6 = arith.constant 0 : index
    %c0_7 = arith.constant 0 : index
    %9 = vector.load %arg4[%c0_6, %c0_7] : memref<256x128xbf16, #tpu.memory_space<vmem>>, vector<256x128xbf16>
    %cst_8 = arith.constant dense<0.000000e+00> : vector<16x128xf32>
    %10 = tpu.matmul %8, %9, %cst_8 {dimension_numbers = #tpu.dot_dimension_numbers<[1], [0], [0], [1], [0, 0, 1, 1], [], []>} : vector<16x256xbf16>, vector<256x128xbf16>, vector<16x128xf32> -> vector<16x128xf32>
    %c0_9 = arith.constant 0 : index
    %c0_10 = arith.constant 0 : index
    %11 = vector.load %arg5[%c0_9, %c0_10] : memref<1x128xf32, #tpu.memory_space<vmem>>, vector<1x128xf32>
    %12 = vector.broadcast %11 : vector<1x128xf32> to vector<16x128xf32>
    %13 = arith.addf %10, %12 : vector<16x128xf32>
    %c0_11 = arith.constant 0 : index
    %c0_12 = arith.constant 0 : index
    %14 = vector.load %arg6[%c0_11, %c0_12] : memref<16x128xf32, #tpu.memory_space<vmem>>, vector<16x128xf32>
    tpu.vector_store %arg6[%c0_11, %c0_12], %13 {strides = array<i32>} : memref<16x128xf32, #tpu.memory_space<vmem>>, vector<16x128xf32>,
    return
  }
  func.func @transform_0(%arg0: i32) -> (i32, i32) {
    %c0_i32 = arith.constant 0 : i32
    %c0_i32_0 = arith.constant 0 : i32
    return %arg0, %c0_i32 : i32, i32
  }
  func.func @transform_1(%arg0: i32) -> (i32, i32) {
    %c0_i32 = arith.constant 0 : i32
    %c0_i32_0 = arith.constant 0 : i32
    %c0_i32_1 = arith.constant 0 : i32
    return %c0_i32, %c0_i32_0 : i32, i32
  }
  func.func @transform_2(%arg0: i32) -> (i32, i32) {
    %c0_i32 = arith.constant 0 : i32
    %c0_i32_0 = arith.constant 0 : i32
    %c0_i32_1 = arith.constant 0 : i32
    return %c0_i32, %c0_i32_0 : i32, i32
  }
  func.func @transform_3(%arg0: i32) -> (i32, i32) {
    %c0_i32 = arith.constant 0 : i32
    %c0_i32_0 = arith.constant 0 : i32
    %c0_i32_1 = arith.constant 0 : i32
    return %c0_i32, %c0_i32_0 : i32, i32
  }
  func.func @transform_4(%arg0: i32) -> (i32, i32) {
    %c0_i32 = arith.constant 0 : i32
    %c0_i32_0 = arith.constant 0 : i32
    %c0_i32_1 = arith.constant 0 : i32
    return %c0_i32, %c0_i32_0 : i32, i32
  }
  func.func @transform_5(%arg0: i32) -> (i32, i32) {
    %c0_i32 = arith.constant 0 : i32
    %c0_i32_0 = arith.constant 0 : i32
    return %arg0, %c0_i32 : i32, i32
  }
}

</mosaic_0001>

<bundles_post_ra>
// kernel: positionwise_ffn.1
= control target key start
LH: loop header
LB: loop body
LE: loop exit
PB: predicated region body
PF: predicated region fallthrough
CT: control target
= control target key end

     0   :  { %v506_v2 = vmov 0   ;;  %s657_s0 = inlined_call_operand.vmem [shape: bf16[16,128], index: 0, kind: input, shape index: {}]   ;;  %s658_s1 = inlined_call_operand.vmem [shape: bf16[128,256], index: 1, kind: input, shape index: {}]   ;;  %s659_s2 = inlined_call_operand.vmem [shape: f32[1,256], index: 2, kind: input, shape index: {}]   ;;  %s660_s3 = inlined_call_operand.vmem [shape: bf16[256,128], index: 3, kind: input, shape index: {}]   ;;  %s661_s4 = inlined_call_operand.vmem [shape: f32[1,128], index: 4, kind: input, shape index: {}]   ;;  %s662_s5 = inlined_call_operand.hbm [shape: f32[16,128], index: 5, kind: output, shape index: {}]  }
   0x1   :  { %v441_v0 = vld [vmem:[%s658_s1 + $0x4] ss:$8 sps:$4 sm:$0xff]   ;;  %v443_v1 = vld [vmem:[%s658_s1] ss:$8 sps:$4 sm:$0xff]   ;;  %170 = vmatprep.mubr.bf16.mxu0 %v506_v2  ;;  %v444_v3 = vld [vmem:[%s658_s1 + $0x14] ss:$8 sps:$4 sm:$0xff]  }
   0x2   :  { %138 = vmatprep.subr.bf16.mxu0 %v441_v0  ;;  %v446_v4 = vld [vmem:[%s658_s1 + $0x10] ss:$8 sps:$4 sm:$0xff]   ;;  %v447_v5 = vld [vmem:[%s658_s1 + $0x24] ss:$8 sps:$4 sm:$0xff]   ;;  %v449_v6 = vld [vmem:[%s658_s1 + $0x20] ss:$8 sps:$4 sm:$0xff]  }
   0x3   :  { %139 = vmatpush1.bf16.msra.mxu0 %v443_v1  ;;  %v450_v7 = vld [vmem:[%s658_s1 + $0x34] ss:$8 sps:$4 sm:$0xff]   ;;  %v452_v8 = vld [vmem:[%s658_s1 + $0x30] ss:$8 sps:$4 sm:$0xff]   ;;  %v453_v9 = vld [vmem:[%s658_s1 + $0x44] ss:$8 sps:$4 sm:$0xff]  }
   0x4   :  { %140 = vmatprep.subr.bf16.mxu0 %v444_v3  ;;  %v466_v10 = vld [vmem:[%s660_s3 + $0x40] sm:$0xff]   ;;  %v456_v13 = vld [vmem:[%s658_s1 + $0x54] ss:$8 sps:$4 sm:$0xff]   ;;  %v468_v14 = vld [vmem:[%s660_s3 + $0x48] sm:$0xff]  }
   0x5   :  { %v455_v11 = vld [vmem:[%s658_s1 + $0x40] ss:$8 sps:$4 sm:$0xff]   ;;  %415 = vmatprep.subr.bf16.mxu1 %v466_v10  ;;  %v470_v16 = vld [vmem:[%s660_s3 + $0x50] sm:$0xff]   ;;  %v459_v18 = vld [vmem:[%s658_s1 + $0x64] ss:$8 sps:$4 sm:$0xff]  }
   0x6   :  { %v467_v12 = vld [vmem:[%s660_s3] sm:$0xff]   ;;  %v469_v15 = vld [vmem:[%s660_s3 + $0x8] sm:$0xff]   ;;  %v458_v17 = vld [vmem:[%s658_s1 + $0x50] ss:$8 sps:$4 sm:$0xff]  }
   0x7   :  { %141 = vmatpush1.bf16.msra.mxu0 %v446_v4  ;;  %416 = vmatpush3.bf16.msra.mxu1 %v467_v12  ;;  %v471_v19 = vld [vmem:[%s660_s3 + $0x10] sm:$0xff]   ;;  %v472_v20 = vld [vmem:[%s660_s3 + $0x58] sm:$0xff]   ;;  %v461_v21 = vld [vmem:[%s658_s1 + $0x60] ss:$8 sps:$4 sm:$0xff]  }
   0x8   :  { %142 = vmatprep.subr.bf16.mxu0 %v447_v5  ;;  %417 = vmatprep.subr.bf16.mxu1 %v468_v14  ;;  %v462_v22 = vld [vmem:[%s658_s1 + $0x74] ss:$8 sps:$4 sm:$0xff]   ;;  %v474_v24 = vld [vmem:[%s660_s3 + $0x60] sm:$0xff]  }
   0x9   :  { %v473_v23 = vld [vmem:[%s660_s3 + $0x18] sm:$0xff]  }
   0xb   :  { %143 = vmatpush1.bf16.msra.mxu0 %v449_v6  ;;  %418 = vmatpush3.bf16.msra.mxu1 %v469_v15 }
   0xc   :  { %144 = vmatprep.subr.bf16.mxu0 %v450_v7  ;;  %419 = vmatprep.subr.bf16.mxu1 %v470_v16 }
   0xf   :  { %145 = vmatpush1.bf16.msra.mxu0 %v452_v8  ;;  %420 = vmatpush3.bf16.msra.mxu1 %v471_v19 }
  0x10   :  { %146 = vmatprep.subr.bf16.mxu0 %v453_v9  ;;  %421 = vmatprep.subr.bf16.mxu1 %v472_v20 }
  0x13   :  { %147 = vmatpush1.bf16.msra.mxu0 %v455_v11 }
  0x14   :  { %148 = vmatprep.subr.bf16.mxu0 %v456_v13 }
  0x17   :  { %149 = vmatpush1.bf16.msra.mxu0 %v458_v17 }
  0x18   :  { %150 = vmatprep.subr.bf16.mxu0 %v459_v18 }
  0x19   :  { %10 = vsyncpa [#allocation3], 0  ;;  %v464_v25 = vld [vmem:[%s658_s1 + $0x70] ss:$8 sps:$4 sm:$0xff]   ;;  %422 = vmatpush3.bf16.msra.mxu1 %v473_v23  ;;  %v475_v26 = vld [vmem:[%s660_s3 + $0x20] sm:$0xff]   ;;  %v42_v34 = vlaneseq  ;;  %s507_s9 = smov [#allocation2]  }
  0x1a   :  { %423 = vmatprep.subr.bf16.mxu1 %v474_v24  ;;  %v476_v27 = vld [vmem:[%s660_s3 + $0x68] sm:$0xff]   ;;  %v465_v28 = vld [vmem:[%s657_s0] sm:$0xff]   ;;  %v478_v30 = vld [vmem:[%s660_s3 + $0x70] sm:$0xff]   ;;  %s370_s10 = sshll.u32 %s507_s9, 4  ;;  %s371_s10 = int_to_ptr.vmem [resolvable:$true] %s370_s10 }
  0x1b   :  { %151 = vmatpush1.bf16.msra.mxu0 %v461_v21  ;;  %v477_v29 = vld [vmem:[%s660_s3 + $0x28] sm:$0xff]   ;;  %v479_v31 = vld [vmem:[%s660_s3 + $0x30] sm:$0xff]   ;;  %v480_v32 = vld [vmem:[%s660_s3 + $0x78] sm:$0xff]   ;;  %v43_v35 = vshrl.u32 %v42_v34, 7  ;;  %s482_s11 = scalar_lea.vmem %s371_s10, 256  ;;  %p487_p1 = scmp.lt.s32.totalorder %s371_s10, %s371_s10 }
  0x1c   :  { %152 = vmatprep.subr.bf16.mxu0 %v462_v22  ;;  %v481_v33 = vld [vmem:[%s660_s3 + $0x38] sm:$0xff]   ;;  %v40_v37 = vld [vmem:[%s659_s2] sm:$0x3]  ;;  %p483_p0 = scmp.ne.s32.totalorder %s371_s10, %s482_s11  ;;  %p488_p2 = scmp.lt.s32.totalorder %s482_s11, %s482_s11 }
  0x1d   :  { %424 = vmatpush3.bf16.msra.mxu1 %v475_v26  ;;  %v44_v36 = vsub.s32 0, %v43_v35  ;;  %v48_v38 = vsub.s32 1, %v43_v35  ;;  %v398_v56 = vld [vmem:[%s661_s4] ss:$0 sm:$0xff] }
  0x1e   :  { %425 = vmatprep.subr.bf16.mxu1 %v476_v27  ;;  %p489_p3 = por %p488_p2, %p487_p1 }
  0x1f   :  { %153 = vmatpush1.bf16.msra.mxu0 %v464_v25  ;;  %v45_v39 = vrot.slane %v40_v37, %v44_v36  ;;  %v49_v40 = vrot.slane %v40_v37, %v48_v38 }
  0x20   :  { %p490_p4 = pnand %p489_p3, %p483_p0 }
  0x21   :  { %426 = vmatpush3.bf16.msra.mxu1 %v477_v29 }
  0x22   :  { %171 = vmatmul.mubr.bf16.vlgmr.msra.gmra.mrb[0].mxu0 %v465_v28  ;;  %427 = vmatprep.subr.bf16.mxu1 %v478_v30 }
  0x25   :  { %428 = vmatpush3.bf16.msra.mxu1 %v479_v31 }
  0x26   :  { %429 = vmatprep.subr.bf16.mxu1 %v480_v32 }
  0x29   :  { %430 = vmatpush3.bf16.msra.mxu1 %v481_v33 }
  0xf5   :  { %v172_v41 = vpop.f32.mrb[0].mxu0 }
  0xf6   :  { %v173_v42 = vadd.f32 %v172_v41, %v45_v39  ;;  %v174_v43 = vpop.f32.mrb[1].mxu0 }
  0xf7   :  { %v175_v44 = vadd.f32 %v174_v43, %v49_v40  ;;  %v176_v45 = vpop.f32.mrb[2].mxu0 }
  0xf8   :  { %v177_v46 = vadd.f32 %v176_v45, %v45_v39  ;;  %v178_v47 = vpop.f32.mrb[3].mxu0  ;;  %v181_v49 = vmax.f32 %v173_v42, 0.0 }
  0xf9   :  { %v179_v48 = vadd.f32 %v178_v47, %v49_v40  ;;  %v182_v51 = vmax.f32 %v175_v44, 0.0 }
  0xfa   :  { %v183_v50 = vmax.f32 %v177_v46, 0.0 }
  0xfb   :  { %v184_v52 = vmax.f32 %v179_v48, 0.0 }
  0xfc   :  { %v185_v53 = vpack.c.bf16 %v183_v50, %v181_v49 }
  0xfd   :  { %v186_v54 = vpack.c.bf16 %v184_v52, %v182_v51 }
  0xff   :  { %354 = vmatprep.mubr.bf16.mxu1 %v186_v54 }
 0x100   :  { %355 = vmatmul.mubr.bf16.vlgmr.msra.gmra.mrb[0].mxu1 %v185_v53 }
 0x1d3   :  { %v431_v55 = vpop.f32.mrb[0].mxu1 }
 0x1d4   :  { %v432_v57 = vpop.f32.mrb[1].mxu1 }
 0x1d5   :  { %v433_v58 = vadd.f32 %v432_v57, %v431_v55  ;;  %v434_v59 = vpop.f32.mrb[2].mxu1 }
 0x1d6   :  { %v435_v60 = vpop.f32.mrb[3].mxu1 }
 0x1d7   :  { %v357_v61 = vadd.f32 %v433_v58, %v398_v56  ;;  %v436_v62 = vadd.f32 %v435_v60, %v434_v59 }
 0x1d9   :  { %363 = vst [vmem:[#allocation2] sm:$0xff] %v357_v61  ;;  %v360_v63 = vadd.f32 %v436_v62, %v398_v56 }
 0x1db   :  { %364 = vst [vmem:[#allocation2 + $0x8] sm:$0xff] %v360_v63 }
 0x1dc   :  { %493 = shalt.err (!%p490_p4)
}
 0x1dd   :  { %s494_s13 = scalar_lea.hbm %s662_s5, 256 }
 0x1de   :  { %p495_p5 = scmp.ne.s32.totalorder %s662_s5, %s494_s13  ;;  %p498_p6 = scmp.lt.u32.totalorder %s494_s13, %s662_s5 }
 0x1e0   :  { %p500_p7 = pnand %p498_p6, %p495_p5 }
 0x1e2   :  { %503 = shalt.err (!%p500_p7)
}
 0x1e3   :  { %s508_s18 = smov 128   ;;  %s509_s19 = smov 8  }
 0x1e4   :  { %376 = dma.vmem_to_hbm [thread:$0]  %s371_s10, 256, %s662_s5, [#allocation3], %s508_s18, %s508_s18, %s509_s19  }
 0x1e5   :  { %504 = dma.done.wait [#allocation3], 256  }
 0x1e6   :  { %505 = vsyncadd [#allocation3], 4294967040 }
 0x1e7   :  { %380 = vsyncpa [#allocation3], 1 }

</bundles_post_ra>
